<compile_context>
chip_gen: v6e
topology: v6e:2x2x1
jax: 0.10.0
libtpu: 0.0.40
codegen_flags: <defaults>
</compile_context>

<pallas_src>
import numpy as np
import jax
import jax.numpy as jnp
from jax import lax
from jax.experimental import pallas as pl
from jax.experimental.pallas import tpu as pltpu

# ---------------- configuration (small, consistent with the module's __init__) ----------------
BATCH = 2
SEQ_LEN = 8                       # tokens per sentence
NUM_TRANSITIONS = 2 * SEQ_LEN - 1 # full binary-tree shift/reduce sequence
VOCAB = 20
WORD_EMBEDDING_DIM = 16
MODEL_DIM = 32                    # must be even: split into (h, c) halves for TreeLSTM
HIDDEN = MODEL_DIM // 2
NUM_SPINN_LAYERS = 2              # kernel below is written for exactly 2 layers
USE_RELU = True                   # kwargs['deep_nonlinear']
MLP_DIM = 32
NUM_CLASSES = 3
SHIFT, REDUCE = 0, 1
GPAD = 128                        # lane-padded width for gates (5*HIDDEN=80) and logits (3)

assert NUM_SPINN_LAYERS == 2
assert 5 * HIDDEN <= GPAD and NUM_CLASSES <= GPAD


# ---------------------------------- fused Pallas kernel ----------------------------------
def deep_spinn_kernel(trans_ref,                       # SMEM [B, T] int32 (scalar prefetch)
                      embeds_ref,                      # [1, L, E]   (this example's embeddings)
                      enc_w0_ref, enc_b0_ref,          # [E, D], [1, D]
                      enc_w1_ref, enc_b1_ref,          # [D, D], [1, D]
                      comp_w0_ref, comp_b0_ref,        # [2H, GPAD], [1, GPAD]   (WL;WR stacked)
                      comp_w1_ref, comp_b1_ref,        # [3H, GPAD], [1, GPAD]   (WL;WR;WE stacked)
                      mlp_w1_ref, mlp_b1_ref,          # [D, MLP_DIM], [1, MLP_DIM]
                      mlp_w2_ref, mlp_b2_ref,          # [MLP_DIM, GPAD], [1, GPAD]
                      out_ref,                         # [1, 1, GPAD]
                      buf_ref, stack_ref,              # VMEM [NUM_LAYERS, L, D] each
                      sp_ref, bp_ref):                 # SMEM [NUM_LAYERS] int32 each
    b_ex = pl.program_id(0)
    H, D, L = HIDDEN, MODEL_DIM, SEQ_LEN
    enc_w = (enc_w0_ref, enc_w1_ref)
    enc_b = (enc_b0_ref, enc_b1_ref)
    comp_w = (comp_w0_ref, comp_w1_ref)
    comp_b = (comp_b0_ref, comp_b1_ref)

    # ----- init per-example state (stacks zeroed, pointers at 0) -----
    stack_ref[...] = jnp.zeros(stack_ref.shape, stack_ref.dtype)
    for i in range(NUM_SPINN_LAYERS):
        sp_ref[i] = jnp.int32(0)
        bp_ref[i] = jnp.int32(0)

    # ----- cascaded encode projections (dropout is identity in eval mode) -----
    x = embeds_ref[0]                                          # [L, E]
    for i in range(NUM_SPINN_LAYERS):
        if USE_RELU and i > 0:
            x = jnp.maximum(x, 0.0)
        x = (jnp.dot(x, enc_w[i][...], preferred_element_type=jnp.float32)
             + enc_b[i][...])                                  # [L, D]
        buf_ref[i] = x

    # ----- shift/reduce stack machine over the transition sequence -----
    def time_step(t, carry):
        tr = trans_ref[b_ex, t]
        is_shift = tr == SHIFT
        ext_h = None                                           # prev layer's post-step top h
        for i in range(NUM_SPINN_LAYERS):
            sp_i = sp_ref[i]
            bp_i = bp_ref[i]
            ext_prev = ext_h

            @pl.when(is_shift)
            def _shift():
                val = buf_ref[i, pl.ds(jnp.minimum(bp_i, L - 1), 1), :]        # [1, D]
                stack_ref[i, pl.ds(jnp.minimum(sp_i, L - 1), 1), :] = val
                sp_ref[i] = sp_i + 1
                bp_ref[i] = bp_i + 1

            @pl.when(jnp.logical_not(is_shift))
            def _reduce():
                # operands come from the stack state BEFORE this step's update
                right = stack_ref[i, pl.ds(jnp.maximum(sp_i - 1, 0), 1), :]    # [1, D]
                left = stack_ref[i, pl.ds(jnp.maximum(sp_i - 2, 0), 1), :]     # [1, D]
                lh, lc = left[:, :H], left[:, H:]
                rh, rc = right[:, :H], right[:, H:]
                if i == 0:
                    # layer 0: external_size = None -> no external contribution
                    xin = jnp.concatenate([lh, rh], axis=1)                    # [1, 2H]
                else:
                    # deep layer: previous layer's post-step top-of-stack h
                    xin = jnp.concatenate([lh, rh, ext_prev], axis=1)          # [1, 3H]
                gates = (jnp.dot(xin, comp_w[i][...],
                                 preferred_element_type=jnp.float32)
                         + comp_b[i][...])                                     # [1, GPAD]
                a_i = gates[:, 0 * H:1 * H]
                a_fl = gates[:, 1 * H:2 * H]
                a_fr = gates[:, 2 * H:3 * H]
                a_o = gates[:, 3 * H:4 * H]
                a_g = gates[:, 4 * H:5 * H]
                c_new = (jax.nn.sigmoid(a_fl) * lc
                         + jax.nn.sigmoid(a_fr) * rc
                         + jax.nn.sigmoid(a_i) * jnp.tanh(a_g))
                h_new = jax.nn.sigmoid(a_o) * jnp.tanh(c_new)
                composed = jnp.concatenate([h_new, c_new], axis=1)             # [1, D]
                stack_ref[i, pl.ds(jnp.maximum(sp_i - 2, 0), 1), :] = composed
                sp_ref[i] = sp_i - 1

            # external input for layer i+1: THIS layer's top-of-stack AFTER its update
            sp_new = sp_ref[i]
            top = stack_ref[i, pl.ds(jnp.maximum(sp_new - 1, 0), 1), :]        # [1, D]
            ext_h = top[:, :H]
        return carry

    lax.fori_loop(0, NUM_TRANSITIONS, time_step, 0)

    # ----- final layer top-of-stack -> features -> MLP classifier -----
    sp_last = sp_ref[NUM_SPINN_LAYERS - 1]
    h_top = stack_ref[NUM_SPINN_LAYERS - 1,
                      pl.ds(jnp.maximum(sp_last - 1, 0), 1), :]                # [1, D]
    hid = jnp.maximum(
        jnp.dot(h_top, mlp_w1_ref[...], preferred_element_type=jnp.float32)
        + mlp_b1_ref[...], 0.0)                                                # [1, MLP_DIM]
    logits = (jnp.dot(hid, mlp_w2_ref[...], preferred_element_type=jnp.float32)
              + mlp_b2_ref[...])                                               # [1, GPAD]
    out_ref[0] = logits.astype(out_ref.dtype)


# ---------------------------------- parameter init ----------------------------------
def init_params(key):
    params = {}
    keys = jax.random.split(key, 16)
    k = iter(keys)
    params['embedding'] = 0.1 * jax.random.normal(next(k), (VOCAB, WORD_EMBEDDING_DIM),
                                                  jnp.float32)
    enc_w, enc_b = [], []
    comp_wl, comp_wr, comp_we, comp_b = [], [], [], []
    for i in range(NUM_SPINN_LAYERS):
        in_dim = WORD_EMBEDDING_DIM if i == 0 else MODEL_DIM
        enc_w.append(0.1 * jax.random.normal(next(k), (in_dim, MODEL_DIM), jnp.float32))
        enc_b.append(jnp.zeros((1, MODEL_DIM), jnp.float32))
        comp_wl.append(0.1 * jax.random.normal(next(k), (HIDDEN, 5 * HIDDEN), jnp.float32))
        comp_wr.append(0.1 * jax.random.normal(next(k), (HIDDEN, 5 * HIDDEN), jnp.float32))
        if i == 0:
            # layer 0: external_size = None -> external weight unused (dropped in the kernel)
            comp_we.append(jnp.zeros((HIDDEN, 5 * HIDDEN), jnp.float32))
        else:
            comp_we.append(0.1 * jax.random.normal(next(k), (HIDDEN, 5 * HIDDEN), jnp.float32))
        comp_b.append(jnp.zeros((1, 5 * HIDDEN), jnp.float32))
    params.update(encode_w=enc_w, encode_b=enc_b,
                  comp_wl=comp_wl, comp_wr=comp_wr, comp_we=comp_we, comp_b=comp_b)
    params['mlp_w1'] = 0.1 * jax.random.normal(next(k), (MODEL_DIM, MLP_DIM), jnp.float32)
    params['mlp_b1'] = jnp.zeros((1, MLP_DIM), jnp.float32)
    params['mlp_w2'] = 0.1 * jax.random.normal(next(k), (MLP_DIM, NUM_CLASSES), jnp.float32)
    params['mlp_b2'] = jnp.zeros((1, NUM_CLASSES), jnp.float32)
    return params


def _pack_params(params):
    """Stack WL/WR(/WE) into one gate matrix per layer; lane-pad gates and logits to GPAD."""
    comp_w, comp_b = [], []
    for i in range(NUM_SPINN_LAYERS):
        parts = [params['comp_wl'][i], params['comp_wr'][i]]
        if i > 0:
            parts.append(params['comp_we'][i])
        w = jnp.concatenate(parts, axis=0)                                 # [2H or 3H, 5H]
        comp_w.append(jnp.pad(w, ((0, 0), (0, GPAD - 5 * HIDDEN))))
        comp_b.append(jnp.pad(params['comp_b'][i], ((0, 0), (0, GPAD - 5 * HIDDEN))))
    mlp_w2 = jnp.pad(params['mlp_w2'], ((0, 0), (0, GPAD - NUM_CLASSES)))
    mlp_b2 = jnp.pad(params['mlp_b2'], ((0, 0), (0, GPAD - NUM_CLASSES)))
    return comp_w, comp_b, mlp_w2, mlp_b2


# ---------------------------------- forward pass ----------------------------------
@jax.jit
def deep_spinn_forward(params, tokens, transitions):
    B, L = tokens.shape
    E, D, H = WORD_EMBEDDING_DIM, MODEL_DIM, HIDDEN

    embeds = params['embedding'][tokens]                       # [B, L, E]  (gather stays in JAX)
    comp_w, comp_b, mlp_w2p, mlp_b2p = _pack_params(params)

    grid_spec = pltpu.PrefetchScalarGridSpec(
        num_scalar_prefetch=1,                                  # transitions -> SMEM
        grid=(B,),                                              # one example per program
        in_specs=[
            pl.BlockSpec((1, L, E), lambda b, tr: (b, 0, 0)),   # embeds (per example)
            pl.BlockSpec((E, D), lambda b, tr: (0, 0)),         # enc_w0
            pl.BlockSpec((1, D), lambda b, tr: (0, 0)),         # enc_b0
            pl.BlockSpec((D, D), lambda b, tr: (0, 0)),         # enc_w1
            pl.BlockSpec((1, D), lambda b, tr: (0, 0)),         # enc_b1
            pl.BlockSpec((2 * H, GPAD), lambda b, tr: (0, 0)),  # comp_w0 (WL;WR)
            pl.BlockSpec((1, GPAD), lambda b, tr: (0, 0)),      # comp_b0
            pl.BlockSpec((3 * H, GPAD), lambda b, tr: (0, 0)),  # comp_w1 (WL;WR;WE)
            pl.BlockSpec((1, GPAD), lambda b, tr: (0, 0)),      # comp_b1
            pl.BlockSpec((D, MLP_DIM), lambda b, tr: (0, 0)),   # mlp_w1
            pl.BlockSpec((1, MLP_DIM), lambda b, tr: (0, 0)),   # mlp_b1
            pl.BlockSpec((MLP_DIM, GPAD), lambda b, tr: (0, 0)),# mlp_w2 (lane-padded)
            pl.BlockSpec((1, GPAD), lambda b, tr: (0, 0)),      # mlp_b2 (lane-padded)
        ],
        out_specs=pl.BlockSpec((1, 1, GPAD), lambda b, tr: (b, 0, 0)),
        scratch_shapes=[
            pltpu.VMEM((NUM_SPINN_LAYERS, L, D), jnp.float32),  # per-layer encoded buffers
            pltpu.VMEM((NUM_SPINN_LAYERS, L, D), jnp.float32),  # per-layer stacks
            pltpu.SMEM((NUM_SPINN_LAYERS,), jnp.int32),         # stack pointers
            pltpu.SMEM((NUM_SPINN_LAYERS,), jnp.int32),         # buffer pointers
        ],
    )

    out_pad = pl.pallas_call(
        deep_spinn_kernel,
        out_shape=jax.ShapeDtypeStruct((B, 1, GPAD), jnp.float32),
        grid_spec=grid_spec,
        compiler_params=pltpu.CompilerParams(
            dimension_semantics=("parallel",)),                 # batch split across v7x TCs
    )(transitions, embeds,
      params['encode_w'][0], params['encode_b'][0],
      params['encode_w'][1], params['encode_b'][1],
      comp_w[0], comp_b[0], comp_w[1], comp_b[1],
      params['mlp_w1'], params['mlp_b1'], mlp_w2p, mlp_b2p)

    return out_pad[:, 0, :NUM_CLASSES]                          # slice lane-padded logits


# ---------------------------------- driver ----------------------------------
def make_transitions():
    # deterministic, valid shift/reduce sequences (0 = SHIFT, 1 = REDUCE)
    left_branching = []
    for j in range(SEQ_LEN):
        left_branching.append(SHIFT)
        if j >= 1:
            left_branching.append(REDUCE)
    right_branching = [SHIFT] * SEQ_LEN + [REDUCE] * (SEQ_LEN - 1)
    trans = np.stack([np.array(left_branching, dtype=np.int32),
                      np.array(right_branching, dtype=np.int32)])
    assert trans.shape == (BATCH, NUM_TRANSITIONS)
    return trans


if __name__ == "__main__":
    key = jax.random.PRNGKey(0)
    pkey, tkey = jax.random.split(key)
    params = init_params(pkey)

    tokens = jax.random.randint(tkey, (BATCH, SEQ_LEN), 0, VOCAB, dtype=jnp.int32)
    transitions = jnp.asarray(make_transitions(), dtype=jnp.int32)

    out = deep_spinn_forward(params, tokens, transitions)
    out = jax.block_until_ready(out)
    assert out.shape == (BATCH, NUM_CLASSES)
    assert bool(jnp.all(jnp.isfinite(out)))
    print("KERNEL_OK")
</pallas_src>

<mosaic_0001>
module attributes {stable_mosaic.version = 11 : i64} {
  func.func @deep_spinn_kernel(%arg0: i32, %arg1: memref<2x15xi32, #tpu.memory_space<smem>>, %arg2: memref<1x8x16xf32, #tpu.memory_space<vmem>>, %arg3: memref<16x32xf32, #tpu.memory_space<vmem>>, %arg4: memref<1x32xf32, #tpu.memory_space<vmem>>, %arg5: memref<32x32xf32, #tpu.memory_space<vmem>>, %arg6: memref<1x32xf32, #tpu.memory_space<vmem>>, %arg7: memref<32x128xf32, #tpu.memory_space<vmem>>, %arg8: memref<1x128xf32, #tpu.memory_space<vmem>>, %arg9: memref<48x128xf32, #tpu.memory_space<vmem>>, %arg10: memref<1x128xf32, #tpu.memory_space<vmem>>, %arg11: memref<32x32xf32, #tpu.memory_space<vmem>>, %arg12: memref<1x32xf32, #tpu.memory_space<vmem>>, %arg13: memref<32x128xf32, #tpu.memory_space<vmem>>, %arg14: memref<1x128xf32, #tpu.memory_space<vmem>>, %arg15: memref<1x1x128xf32, #tpu.memory_space<vmem>>, %arg16: memref<2x8x32xf32, #tpu.memory_space<vmem>>, %arg17: memref<2x8x32xf32, #tpu.memory_space<vmem>>, %arg18: memref<2xi32, #tpu.memory_space<smem>>, %arg19: memref<2xi32, #tpu.memory_space<smem>>) attributes {dimension_semantics = [#tpu.dimension_semantics<parallel>], iteration_bounds = array<i64: 2>, scalar_prefetch = 1 : i64, scratch_operands = 4 : i64, tpu.core_type = #tpu.core_type<tc>, window_params = [{transform_indices = @transform_0, window_bounds = array<i64: 1, 8, 16>}, {pipeline_mode = #tpu.pipeline_mode<synchronous>, transform_indices = @transform_1, window_bounds = array<i64: 16, 32>}, {pipeline_mode = #tpu.pipeline_mode<synchronous>, transform_indices = @transform_2, window_bounds = array<i64: 1, 32>}, {pipeline_mode = #tpu.pipeline_mode<synchronous>, transform_indices = @transform_3, window_bounds = array<i64: 32, 32>}, {pipeline_mode = #tpu.pipeline_mode<synchronous>, transform_indices = @transform_4, window_bounds = array<i64: 1, 32>}, {pipeline_mode = #tpu.pipeline_mode<synchronous>, transform_indices = @transform_5, window_bounds = array<i64: 32, 128>}, {pipeline_mode = #tpu.pipeline_mode<synchronous>, transform_indices = @transform_6, window_bounds = array<i64: 1, 128>}, {pipeline_mode = #tpu.pipeline_mode<synchronous>, transform_indices = @transform_7, window_bounds = array<i64: 48, 128>}, {pipeline_mode = #tpu.pipeline_mode<synchronous>, transform_indices = @transform_8, window_bounds = array<i64: 1, 128>}, {pipeline_mode = #tpu.pipeline_mode<synchronous>, transform_indices = @transform_9, window_bounds = array<i64: 32, 32>}, {pipeline_mode = #tpu.pipeline_mode<synchronous>, transform_indices = @transform_10, window_bounds = array<i64: 1, 32>}, {pipeline_mode = #tpu.pipeline_mode<synchronous>, transform_indices = @transform_11, window_bounds = array<i64: 32, 128>}, {pipeline_mode = #tpu.pipeline_mode<synchronous>, transform_indices = @transform_12, window_bounds = array<i64: 1, 128>}, {transform_indices = @transform_13, window_bounds = array<i64: 1, 1, 128>}]} {
    %cst = arith.constant 0.000000e+00 : f32
    %0 = vector.broadcast %cst : f32 to vector<2x8x32xf32>
    %c0 = arith.constant 0 : index
    %c0_0 = arith.constant 0 : index
    %c0_1 = arith.constant 0 : index
    %1 = vector.load %arg17[%c0, %c0_0, %c0_1] : memref<2x8x32xf32, #tpu.memory_space<vmem>>, vector<2x8x32xf32>
    tpu.vector_store %arg17[%c0, %c0_0, %c0_1], %0 {strides = array<i32>} : memref<2x8x32xf32, #tpu.memory_space<vmem>>, vector<2x8x32xf32>,
    %c0_i32 = arith.constant 0 : i32
    %c0_2 = arith.constant 0 : index
    %2 = memref.load %arg18[%c0_2] : memref<2xi32, #tpu.memory_space<smem>>
    memref.store %c0_i32, %arg18[%c0_2] : memref<2xi32, #tpu.memory_space<smem>>
    %c0_i32_3 = arith.constant 0 : i32
    %c0_4 = arith.constant 0 : index
    %3 = memref.load %arg19[%c0_4] : memref<2xi32, #tpu.memory_space<smem>>
    memref.store %c0_i32_3, %arg19[%c0_4] : memref<2xi32, #tpu.memory_space<smem>>
    %c0_i32_5 = arith.constant 0 : i32
    %c1 = arith.constant 1 : index
    %4 = memref.load %arg18[%c1] : memref<2xi32, #tpu.memory_space<smem>>
    memref.store %c0_i32_5, %arg18[%c1] : memref<2xi32, #tpu.memory_space<smem>>
    %c0_i32_6 = arith.constant 0 : i32
    %c1_7 = arith.constant 1 : index
    %5 = memref.load %arg19[%c1_7] : memref<2xi32, #tpu.memory_space<smem>>
    memref.store %c0_i32_6, %arg19[%c1_7] : memref<2xi32, #tpu.memory_space<smem>>
    %c0_8 = arith.constant 0 : index
    %c0_9 = arith.constant 0 : index
    %c0_10 = arith.constant 0 : index
    %6 = vector.load %arg2[%c0_8, %c0_9, %c0_10] : memref<1x8x16xf32, #tpu.memory_space<vmem>>, vector<1x8x16xf32>
    %7 = vector.shape_cast %6 : vector<1x8x16xf32> to vector<8x16xf32>
    %c0_11 = arith.constant 0 : index
    %c0_12 = arith.constant 0 : index
    %8 = vector.load %arg3[%c0_11, %c0_12] : memref<16x32xf32, #tpu.memory_space<vmem>>, vector<16x32xf32>
    %cst_13 = arith.constant dense<0.000000e+00> : vector<8x32xf32>
    %9 = tpu.matmul %7, %8, %cst_13 {dimension_numbers = #tpu.dot_dimension_numbers<[1], [0], [0], [1], [0, 0, 1, 1], [], []>} : vector<8x16xf32>, vector<16x32xf32>, vector<8x32xf32> -> vector<8x32xf32>
    %c0_14 = arith.constant 0 : index
    %c0_15 = arith.constant 0 : index
    %10 = vector.load %arg4[%c0_14, %c0_15] : memref<1x32xf32, #tpu.memory_space<vmem>>, vector<1x32xf32>
    %11 = vector.broadcast %10 : vector<1x32xf32> to vector<8x32xf32>
    %12 = arith.addf %9, %11 : vector<8x32xf32>
    %c0_16 = arith.constant 0 : index
    %c0_17 = arith.constant 0 : index
    %c0_18 = arith.constant 0 : index
    %13 = vector.load %arg16[%c0_16, %c0_17, %c0_18] : memref<2x8x32xf32, #tpu.memory_space<vmem>>, vector<1x8x32xf32>
    %14 = vector.shape_cast %13 : vector<1x8x32xf32> to vector<8x32xf32>
    %15 = vector.shape_cast %12 : vector<8x32xf32> to vector<1x8x32xf32>
    tpu.vector_store %arg16[%c0_16, %c0_17, %c0_18], %15 {strides = array<i32>} : memref<2x8x32xf32, #tpu.memory_space<vmem>>, vector<1x8x32xf32>,
    %cst_19 = arith.constant 0.000000e+00 : f32
    %16 = vector.broadcast %cst_19 : f32 to vector<8x32xf32>
    %17 = arith.maximumf %12, %16 : vector<8x32xf32>
    %c0_20 = arith.constant 0 : index
    %c0_21 = arith.constant 0 : index
    %18 = vector.load %arg5[%c0_20, %c0_21] : memref<32x32xf32, #tpu.memory_space<vmem>>, vector<32x32xf32>
    %cst_22 = arith.constant dense<0.000000e+00> : vector<8x32xf32>
    %19 = tpu.matmul %17, %18, %cst_22 {dimension_numbers = #tpu.dot_dimension_numbers<[1], [0], [0], [1], [0, 0, 1, 1], [], []>} : vector<8x32xf32>, vector<32x32xf32>, vector<8x32xf32> -> vector<8x32xf32>
    %c0_23 = arith.constant 0 : index
    %c0_24 = arith.constant 0 : index
    %20 = vector.load %arg6[%c0_23, %c0_24] : memref<1x32xf32, #tpu.memory_space<vmem>>, vector<1x32xf32>
    %21 = vector.broadcast %20 : vector<1x32xf32> to vector<8x32xf32>
    %22 = arith.addf %19, %21 : vector<8x32xf32>
    %c1_25 = arith.constant 1 : index
    %c0_26 = arith.constant 0 : index
    %c0_27 = arith.constant 0 : index
    %23 = vector.load %arg16[%c1_25, %c0_26, %c0_27] : memref<2x8x32xf32, #tpu.memory_space<vmem>>, vector<1x8x32xf32>
    %24 = vector.shape_cast %23 : vector<1x8x32xf32> to vector<8x32xf32>
    %25 = vector.shape_cast %22 : vector<8x32xf32> to vector<1x8x32xf32>
    tpu.vector_store %arg16[%c1_25, %c0_26, %c0_27], %25 {strides = array<i32>} : memref<2x8x32xf32, #tpu.memory_space<vmem>>, vector<1x8x32xf32>,
    %c0_i32_28 = arith.constant 0 : i32
    %c15_i32 = arith.constant 15 : i32
    %26 = arith.addi %c0_i32_28, %c15_i32 : i32
    %c1_i32 = arith.constant 1 : i32
    scf.for %arg20 = %c0_i32_28 to %26 step %c1_i32  : i32 {
      %46 = arith.index_cast %arg0 : i32 to index
      %47 = arith.index_cast %arg20 : i32 to index
      %48 = memref.load %arg1[%46, %47] : memref<2x15xi32, #tpu.memory_space<smem>>
      %c0_i32_49 = arith.constant 0 : i32
      %49 = arith.cmpi eq, %48, %c0_i32_49 : i32
      %c0_50 = arith.constant 0 : index
      %50 = memref.load %arg18[%c0_50] : memref<2xi32, #tpu.memory_space<smem>>
      %c0_51 = arith.constant 0 : index
      %51 = memref.load %arg19[%c0_51] : memref<2xi32, #tpu.memory_space<smem>>
      %52 = arith.extui %49 : i1 to i32
      %c0_i32_52 = arith.constant 0 : i32
      %53 = arith.cmpi ne, %52, %c0_i32_52 : i32
      scf.if %53 {
        %c7_i32 = arith.constant 7 : i32
        %71 = arith.minsi %51, %c7_i32 : i32
        %c0_64 = arith.constant 0 : index
        %72 = arith.index_cast %71 : i32 to index
        %c0_65 = arith.constant 0 : index
        %73 = vector.load %arg16[%c0_64, %72, %c0_65] : memref<2x8x32xf32, #tpu.memory_space<vmem>>, vector<1x1x32xf32>
        %74 = vector.shape_cast %73 : vector<1x1x32xf32> to vector<1x32xf32>
        %c7_i32_66 = arith.constant 7 : i32
        %75 = arith.minsi %50, %c7_i32_66 : i32
        %c0_67 = arith.constant 0 : index
        %76 = arith.index_cast %75 : i32 to index
        %c0_68 = arith.constant 0 : index
        %77 = vector.load %arg17[%c0_67, %76, %c0_68] : memref<2x8x32xf32, #tpu.memory_space<vmem>>, vector<1x1x32xf32>
        %78 = vector.shape_cast %77 : vector<1x1x32xf32> to vector<1x32xf32>
        %79 = vector.shape_cast %74 : vector<1x32xf32> to vector<1x1x32xf32>
        tpu.vector_store %arg17[%c0_67, %76, %c0_68], %79 {strides = array<i32>} : memref<2x8x32xf32, #tpu.memory_space<vmem>>, vector<1x1x32xf32>,
        %c1_i32_69 = arith.constant 1 : i32
        %80 = arith.addi %50, %c1_i32_69 : i32
        %c0_70 = arith.constant 0 : index
        %81 = memref.load %arg18[%c0_70] : memref<2xi32, #tpu.memory_space<smem>>
        memref.store %80, %arg18[%c0_70] : memref<2xi32, #tpu.memory_space<smem>>
        %c1_i32_71 = arith.constant 1 : i32
        %82 = arith.addi %51, %c1_i32_71 : i32
        %c0_72 = arith.constant 0 : index
        %83 = memref.load %arg19[%c0_72] : memref<2xi32, #tpu.memory_space<smem>>
        memref.store %82, %arg19[%c0_72] : memref<2xi32, #tpu.memory_space<smem>>
      } else {
      }
      %true = arith.constant true
      %54 = arith.xori %49, %true : i1
      %55 = arith.extui %54 : i1 to i32
      %c0_i32_53 = arith.constant 0 : i32
      %56 = arith.cmpi ne, %55, %c0_i32_53 : i32
      scf.if %56 {
        %c1_i32_64 = arith.constant 1 : i32
        %71 = arith.subi %50, %c1_i32_64 : i32
        %c0_i32_65 = arith.constant 0 : i32
        %72 = arith.maxsi %71, %c0_i32_65 : i32
        %c0_66 = arith.constant 0 : index
        %73 = arith.index_cast %72 : i32 to index
        %c0_67 = arith.constant 0 : index
        %74 = vector.load %arg17[%c0_66, %73, %c0_67] : memref<2x8x32xf32, #tpu.memory_space<vmem>>, vector<1x1x32xf32>
        %75 = vector.shape_cast %74 : vector<1x1x32xf32> to vector<1x32xf32>
        %c2_i32 = arith.constant 2 : i32
        %76 = arith.subi %50, %c2_i32 : i32
        %c0_i32_68 = arith.constant 0 : i32
        %77 = arith.maxsi %76, %c0_i32_68 : i32
        %c0_69 = arith.constant 0 : index
        %78 = arith.index_cast %77 : i32 to index
        %c0_70 = arith.constant 0 : index
        %79 = vector.load %arg17[%c0_69, %78, %c0_70] : memref<2x8x32xf32, #tpu.memory_space<vmem>>, vector<1x1x32xf32>
        %80 = vector.shape_cast %79 : vector<1x1x32xf32> to vector<1x32xf32>
        %81 = vector.extract_strided_slice %80 {offsets = [0, 0], sizes = [1, 16], strides = [1, 1]} : vector<1x32xf32> to vector<1x16xf32>
        %82 = vector.extract_strided_slice %80 {offsets = [0, 16], sizes = [1, 16], strides = [1, 1]} : vector<1x32xf32> to vector<1x16xf32>
        %83 = vector.extract_strided_slice %75 {offsets = [0, 0], sizes = [1, 16], strides = [1, 1]} : vector<1x32xf32> to vector<1x16xf32>
        %84 = vector.extract_strided_slice %75 {offsets = [0, 16], sizes = [1, 16], strides = [1, 1]} : vector<1x32xf32> to vector<1x16xf32>
        %85 = tpu.concatenate %81, %83 in 1 : vector<1x16xf32>, vector<1x16xf32> -> vector<1x32xf32>
        %c0_71 = arith.constant 0 : index
        %c0_72 = arith.constant 0 : index
        %86 = vector.load %arg7[%c0_71, %c0_72] : memref<32x128xf32, #tpu.memory_space<vmem>>, vector<32x128xf32>
        %cst_73 = arith.constant dense<0.000000e+00> : vector<1x128xf32>
        %87 = tpu.matmul %85, %86, %cst_73 {dimension_numbers = #tpu.dot_dimension_numbers<[1], [0], [0], [1], [0, 0, 1, 1], [], []>} : vector<1x32xf32>, vector<32x128xf32>, vector<1x128xf32> -> vector<1x128xf32>
        %c0_74 = arith.constant 0 : index
        %c0_75 = arith.constant 0 : index
        %88 = vector.load %arg8[%c0_74, %c0_75] : memref<1x128xf32, #tpu.memory_space<vmem>>, vector<1x128xf32>
        %89 = arith.addf %87, %88 : vector<1x128xf32>
        %90 = vector.extract_strided_slice %89 {offsets = [0, 0], sizes = [1, 16], strides = [1, 1]} : vector<1x128xf32> to vector<1x16xf32>
        %91 = vector.extract_strided_slice %89 {offsets = [0, 16], sizes = [1, 16], strides = [1, 1]} : vector<1x128xf32> to vector<1x16xf32>
        %92 = vector.extract_strided_slice %89 {offsets = [0, 32], sizes = [1, 16], strides = [1, 1]} : vector<1x128xf32> to vector<1x16xf32>
        %93 = vector.extract_strided_slice %89 {offsets = [0, 48], sizes = [1, 16], strides = [1, 1]} : vector<1x128xf32> to vector<1x16xf32>
        %94 = vector.extract_strided_slice %89 {offsets = [0, 64], sizes = [1, 16], strides = [1, 1]} : vector<1x128xf32> to vector<1x16xf32>
        %95 = arith.negf %91 : vector<1x16xf32>
        %96 = math.exp %95 : vector<1x16xf32>
        %cst_76 = arith.constant 1.000000e+00 : f32
        %97 = vector.broadcast %cst_76 : f32 to vector<1x16xf32>
        %98 = arith.addf %97, %96 : vector<1x16xf32>
        %99 = arith.divf %97, %98 : vector<1x16xf32>
        %100 = arith.mulf %99, %82 : vector<1x16xf32>
        %101 = arith.negf %92 : vector<1x16xf32>
        %102 = math.exp %101 : vector<1x16xf32>
        %cst_77 = arith.constant 1.000000e+00 : f32
        %103 = vector.broadcast %cst_77 : f32 to vector<1x16xf32>
        %104 = arith.addf %103, %102 : vector<1x16xf32>
        %105 = arith.divf %103, %104 : vector<1x16xf32>
        %106 = arith.mulf %105, %84 : vector<1x16xf32>
        %107 = arith.addf %100, %106 : vector<1x16xf32>
        %108 = arith.negf %90 : vector<1x16xf32>
        %109 = math.exp %108 : vector<1x16xf32>
        %cst_78 = arith.constant 1.000000e+00 : f32
        %110 = vector.broadcast %cst_78 : f32 to vector<1x16xf32>
        %111 = arith.addf %110, %109 : vector<1x16xf32>
        %112 = arith.divf %110, %111 : vector<1x16xf32>
        %113 = math.tanh %94 : vector<1x16xf32>
        %114 = arith.mulf %112, %113 : vector<1x16xf32>
        %115 = arith.addf %107, %114 : vector<1x16xf32>
        %116 = arith.negf %93 : vector<1x16xf32>
        %117 = math.exp %116 : vector<1x16xf32>
        %cst_79 = arith.constant 1.000000e+00 : f32
        %118 = vector.broadcast %cst_79 : f32 to vector<1x16xf32>
        %119 = arith.addf %118, %117 : vector<1x16xf32>
        %120 = arith.divf %118, %119 : vector<1x16xf32>
        %121 = math.tanh %115 : vector<1x16xf32>
        %122 = arith.mulf %120, %121 : vector<1x16xf32>
        %123 = tpu.concatenate %122, %115 in 1 : vector<1x16xf32>, vector<1x16xf32> -> vector<1x32xf32>
        %c2_i32_80 = arith.constant 2 : i32
        %124 = arith.subi %50, %c2_i32_80 : i32
        %c0_i32_81 = arith.constant 0 : i32
        %125 = arith.maxsi %124, %c0_i32_81 : i32
        %c0_82 = arith.constant 0 : index
        %126 = arith.index_cast %125 : i32 to index
        %c0_83 = arith.constant 0 : index
        %127 = vector.load %arg17[%c0_82, %126, %c0_83] : memref<2x8x32xf32, #tpu.memory_space<vmem>>, vector<1x1x32xf32>
        %128 = vector.shape_cast %127 : vector<1x1x32xf32> to vector<1x32xf32>
        %129 = vector.shape_cast %123 : vector<1x32xf32> to vector<1x1x32xf32>
        tpu.vector_store %arg17[%c0_82, %126, %c0_83], %129 {strides = array<i32>} : memref<2x8x32xf32, #tpu.memory_space<vmem>>, vector<1x1x32xf32>,
        %c1_i32_84 = arith.constant 1 : i32
        %130 = arith.subi %50, %c1_i32_84 : i32
        %c0_85 = arith.constant 0 : index
        %131 = memref.load %arg18[%c0_85] : memref<2xi32, #tpu.memory_space<smem>>
        memref.store %130, %arg18[%c0_85] : memref<2xi32, #tpu.memory_space<smem>>
      } else {
      }
      %c0_54 = arith.constant 0 : index
      %57 = memref.load %arg18[%c0_54] : memref<2xi32, #tpu.memory_space<smem>>
      %c1_i32_55 = arith.constant 1 : i32
      %58 = arith.subi %57, %c1_i32_55 : i32
      %c0_i32_56 = arith.constant 0 : i32
      %59 = arith.maxsi %58, %c0_i32_56 : i32
      %c0_57 = arith.constant 0 : index
      %60 = arith.index_cast %59 : i32 to index
      %c0_58 = arith.constant 0 : index
      %61 = vector.load %arg17[%c0_57, %60, %c0_58] : memref<2x8x32xf32, #tpu.memory_space<vmem>>, vector<1x1x32xf32>
      %62 = vector.shape_cast %61 : vector<1x1x32xf32> to vector<1x32xf32>
      %63 = vector.extract_strided_slice %62 {offsets = [0, 0], sizes = [1, 16], strides = [1, 1]} : vector<1x32xf32> to vector<1x16xf32>
      %c1_59 = arith.constant 1 : index
      %64 = memref.load %arg18[%c1_59] : memref<2xi32, #tpu.memory_space<smem>>
      %c1_60 = arith.constant 1 : index
      %65 = memref.load %arg19[%c1_60] : memref<2xi32, #tpu.memory_space<smem>>
      %66 = arith.extui %49 : i1 to i32
      %c0_i32_61 = arith.constant 0 : i32
      %67 = arith.cmpi ne, %66, %c0_i32_61 : i32
      scf.if %67 {
        %c7_i32 = arith.constant 7 : i32
        %71 = arith.minsi %65, %c7_i32 : i32
        %c1_64 = arith.constant 1 : index
        %72 = arith.index_cast %71 : i32 to index
        %c0_65 = arith.constant 0 : index
        %73 = vector.load %arg16[%c1_64, %72, %c0_65] : memref<2x8x32xf32, #tpu.memory_space<vmem>>, vector<1x1x32xf32>
        %74 = vector.shape_cast %73 : vector<1x1x32xf32> to vector<1x32xf32>
        %c7_i32_66 = arith.constant 7 : i32
        %75 = arith.minsi %64, %c7_i32_66 : i32
        %c1_67 = arith.constant 1 : index
        %76 = arith.index_cast %75 : i32 to index
        %c0_68 = arith.constant 0 : index
        %77 = vector.load %arg17[%c1_67, %76, %c0_68] : memref<2x8x32xf32, #tpu.memory_space<vmem>>, vector<1x1x32xf32>
        %78 = vector.shape_cast %77 : vector<1x1x32xf32> to vector<1x32xf32>
        %79 = vector.shape_cast %74 : vector<1x32xf32> to vector<1x1x32xf32>
        tpu.vector_store %arg17[%c1_67, %76, %c0_68], %79 {strides = array<i32>} : memref<2x8x32xf32, #tpu.memory_space<vmem>>, vector<1x1x32xf32>,
        %c1_i32_69 = arith.constant 1 : i32
        %80 = arith.addi %64, %c1_i32_69 : i32
        %c1_70 = arith.constant 1 : index
        %81 = memref.load %arg18[%c1_70] : memref<2xi32, #tpu.memory_space<smem>>
        memref.store %80, %arg18[%c1_70] : memref<2xi32, #tpu.memory_space<smem>>
        %c1_i32_71 = arith.constant 1 : i32
        %82 = arith.addi %65, %c1_i32_71 : i32
        %c1_72 = arith.constant 1 : index
        %83 = memref.load %arg19[%c1_72] : memref<2xi32, #tpu.memory_space<smem>>
        memref.store %82, %arg19[%c1_72] : memref<2xi32, #tpu.memory_space<smem>>
      } else {
      }
      %true_62 = arith.constant true
      %68 = arith.xori %49, %true_62 : i1
      %69 = arith.extui %68 : i1 to i32
      %c0_i32_63 = arith.constant 0 : i32
      %70 = arith.cmpi ne, %69, %c0_i32_63 : i32
      scf.if %70 {
        %c1_i32_64 = arith.constant 1 : i32
        %71 = arith.subi %64, %c1_i32_64 : i32
        %c0_i32_65 = arith.constant 0 : i32
        %72 = arith.maxsi %71, %c0_i32_65 : i32
        %c1_66 = arith.constant 1 : index
        %73 = arith.index_cast %72 : i32 to index
        %c0_67 = arith.constant 0 : index
        %74 = vector.load %arg17[%c1_66, %73, %c0_67] : memref<2x8x32xf32, #tpu.memory_space<vmem>>, vector<1x1x32xf32>
        %75 = vector.shape_cast %74 : vector<1x1x32xf32> to vector<1x32xf32>
        %c2_i32 = arith.constant 2 : i32
        %76 = arith.subi %64, %c2_i32 : i32
        %c0_i32_68 = arith.constant 0 : i32
        %77 = arith.maxsi %76, %c0_i32_68 : i32
        %c1_69 = arith.constant 1 : index
        %78 = arith.index_cast %77 : i32 to index
        %c0_70 = arith.constant 0 : index
        %79 = vector.load %arg17[%c1_69, %78, %c0_70] : memref<2x8x32xf32, #tpu.memory_space<vmem>>, vector<1x1x32xf32>
        %80 = vector.shape_cast %79 : vector<1x1x32xf32> to vector<1x32xf32>
        %81 = vector.extract_strided_slice %80 {offsets = [0, 0], sizes = [1, 16], strides = [1, 1]} : vector<1x32xf32> to vector<1x16xf32>
        %82 = vector.extract_strided_slice %80 {offsets = [0, 16], sizes = [1, 16], strides = [1, 1]} : vector<1x32xf32> to vector<1x16xf32>
        %83 = vector.extract_strided_slice %75 {offsets = [0, 0], sizes = [1, 16], strides = [1, 1]} : vector<1x32xf32> to vector<1x16xf32>
        %84 = vector.extract_strided_slice %75 {offsets = [0, 16], sizes = [1, 16], strides = [1, 1]} : vector<1x32xf32> to vector<1x16xf32>
        %85 = tpu.concatenate %81, %83, %63 in 1 : vector<1x16xf32>, vector<1x16xf32>, vector<1x16xf32> -> vector<1x48xf32>
        %c0_71 = arith.constant 0 : index
        %c0_72 = arith.constant 0 : index
        %86 = vector.load %arg9[%c0_71, %c0_72] : memref<48x128xf32, #tpu.memory_space<vmem>>, vector<48x128xf32>
        %cst_73 = arith.constant dense<0.000000e+00> : vector<1x128xf32>
        %87 = tpu.matmul %85, %86, %cst_73 {dimension_numbers = #tpu.dot_dimension_numbers<[1], [0], [0], [1], [0, 0, 1, 1], [], []>} : vector<1x48xf32>, vector<48x128xf32>, vector<1x128xf32> -> vector<1x128xf32>
        %c0_74 = arith.constant 0 : index
        %c0_75 = arith.constant 0 : index
        %88 = vector.load %arg10[%c0_74, %c0_75] : memref<1x128xf32, #tpu.memory_space<vmem>>, vector<1x128xf32>
        %89 = arith.addf %87, %88 : vector<1x128xf32>
        %90 = vector.extract_strided_slice %89 {offsets = [0, 0], sizes = [1, 16], strides = [1, 1]} : vector<1x128xf32> to vector<1x16xf32>
        %91 = vector.extract_strided_slice %89 {offsets = [0, 16], sizes = [1, 16], strides = [1, 1]} : vector<1x128xf32> to vector<1x16xf32>
        %92 = vector.extract_strided_slice %89 {offsets = [0, 32], sizes = [1, 16], strides = [1, 1]} : vector<1x128xf32> to vector<1x16xf32>
        %93 = vector.extract_strided_slice %89 {offsets = [0, 48], sizes = [1, 16], strides = [1, 1]} : vector<1x128xf32> to vector<1x16xf32>
        %94 = vector.extract_strided_slice %89 {offsets = [0, 64], sizes = [1, 16], strides = [1, 1]} : vector<1x128xf32> to vector<1x16xf32>
        %95 = arith.negf %91 : vector<1x16xf32>
        %96 = math.exp %95 : vector<1x16xf32>
        %cst_76 = arith.constant 1.000000e+00 : f32
        %97 = vector.broadcast %cst_76 : f32 to vector<1x16xf32>
        %98 = arith.addf %97, %96 : vector<1x16xf32>
        %99 = arith.divf %97, %98 : vector<1x16xf32>
        %100 = arith.mulf %99, %82 : vector<1x16xf32>
        %101 = arith.negf %92 : vector<1x16xf32>
        %102 = math.exp %101 : vector<1x16xf32>
        %cst_77 = arith.constant 1.000000e+00 : f32
        %103 = vector.broadcast %cst_77 : f32 to vector<1x16xf32>
        %104 = arith.addf %103, %102 : vector<1x16xf32>
        %105 = arith.divf %103, %104 : vector<1x16xf32>
        %106 = arith.mulf %105, %84 : vector<1x16xf32>
        %107 = arith.addf %100, %106 : vector<1x16xf32>
        %108 = arith.negf %90 : vector<1x16xf32>
        %109 = math.exp %108 : vector<1x16xf32>
        %cst_78 = arith.constant 1.000000e+00 : f32
        %110 = vector.broadcast %cst_78 : f32 to vector<1x16xf32>
        %111 = arith.addf %110, %109 : vector<1x16xf32>
        %112 = arith.divf %110, %111 : vector<1x16xf32>
        %113 = math.tanh %94 : vector<1x16xf32>
        %114 = arith.mulf %112, %113 : vector<1x16xf32>
        %115 = arith.addf %107, %114 : vector<1x16xf32>
        %116 = arith.negf %93 : vector<1x16xf32>
        %117 = math.exp %116 : vector<1x16xf32>
        %cst_79 = arith.constant 1.000000e+00 : f32
        %118 = vector.broadcast %cst_79 : f32 to vector<1x16xf32>
        %119 = arith.addf %118, %117 : vector<1x16xf32>
        %120 = arith.divf %118, %119 : vector<1x16xf32>
        %121 = math.tanh %115 : vector<1x16xf32>
        %122 = arith.mulf %120, %121 : vector<1x16xf32>
        %123 = tpu.concatenate %122, %115 in 1 : vector<1x16xf32>, vector<1x16xf32> -> vector<1x32xf32>
        %c2_i32_80 = arith.constant 2 : i32
        %124 = arith.subi %64, %c2_i32_80 : i32
        %c0_i32_81 = arith.constant 0 : i32
        %125 = arith.maxsi %124, %c0_i32_81 : i32
        %c1_82 = arith.constant 1 : index
        %126 = arith.index_cast %125 : i32 to index
        %c0_83 = arith.constant 0 : index
        %127 = vector.load %arg17[%c1_82, %126, %c0_83] : memref<2x8x32xf32, #tpu.memory_space<vmem>>, vector<1x1x32xf32>
        %128 = vector.shape_cast %127 : vector<1x1x32xf32> to vector<1x32xf32>
        %129 = vector.shape_cast %123 : vector<1x32xf32> to vector<1x1x32xf32>
        tpu.vector_store %arg17[%c1_82, %126, %c0_83], %129 {strides = array<i32>} : memref<2x8x32xf32, #tpu.memory_space<vmem>>, vector<1x1x32xf32>,
        %c1_i32_84 = arith.constant 1 : i32
        %130 = arith.subi %64, %c1_i32_84 : i32
        %c1_85 = arith.constant 1 : index
        %131 = memref.load %arg18[%c1_85] : memref<2xi32, #tpu.memory_space<smem>>
        memref.store %130, %arg18[%c1_85] : memref<2xi32, #tpu.memory_space<smem>>
      } else {
      }
    }
    %c15_i32_29 = arith.constant 15 : i32
    %c1_30 = arith.constant 1 : index
    %27 = memref.load %arg18[%c1_30] : memref<2xi32, #tpu.memory_space<smem>>
    %c1_i32_31 = arith.constant 1 : i32
    %28 = arith.subi %27, %c1_i32_31 : i32
    %c0_i32_32 = arith.constant 0 : i32
    %29 = arith.maxsi %28, %c0_i32_32 : i32
    %c1_33 = arith.constant 1 : index
    %30 = arith.index_cast %29 : i32 to index
    %c0_34 = arith.constant 0 : index
    %31 = vector.load %arg17[%c1_33, %30, %c0_34] : memref<2x8x32xf32, #tpu.memory_space<vmem>>, vector<1x1x32xf32>
    %32 = vector.shape_cast %31 : vector<1x1x32xf32> to vector<1x32xf32>
    %c0_35 = arith.constant 0 : index
    %c0_36 = arith.constant 0 : index
    %33 = vector.load %arg11[%c0_35, %c0_36] : memref<32x32xf32, #tpu.memory_space<vmem>>, vector<32x32xf32>
    %cst_37 = arith.constant dense<0.000000e+00> : vector<1x32xf32>
    %34 = tpu.matmul %32, %33, %cst_37 {dimension_numbers = #tpu.dot_dimension_numbers<[1], [0], [0], [1], [0, 0, 1, 1], [], []>} : vector<1x32xf32>, vector<32x32xf32>, vector<1x32xf32> -> vector<1x32xf32>
    %c0_38 = arith.constant 0 : index
    %c0_39 = arith.constant 0 : index
    %35 = vector.load %arg12[%c0_38, %c0_39] : memref<1x32xf32, #tpu.memory_space<vmem>>, vector<1x32xf32>
    %36 = arith.addf %34, %35 : vector<1x32xf32>
    %cst_40 = arith.constant 0.000000e+00 : f32
    %37 = vector.broadcast %cst_40 : f32 to vector<1x32xf32>
    %38 = arith.maximumf %36, %37 : vector<1x32xf32>
    %c0_41 = arith.constant 0 : index
    %c0_42 = arith.constant 0 : index
    %39 = vector.load %arg13[%c0_41, %c0_42] : memref<32x128xf32, #tpu.memory_space<vmem>>, vector<32x128xf32>
    %cst_43 = arith.constant dense<0.000000e+00> : vector<1x128xf32>
    %40 = tpu.matmul %38, %39, %cst_43 {dimension_numbers = #tpu.dot_dimension_numbers<[1], [0], [0], [1], [0, 0, 1, 1], [], []>} : vector<1x32xf32>, vector<32x128xf32>, vector<1x128xf32> -> vector<1x128xf32>
    %c0_44 = arith.constant 0 : index
    %c0_45 = arith.constant 0 : index
    %41 = vector.load %arg14[%c0_44, %c0_45] : memref<1x128xf32, #tpu.memory_space<vmem>>, vector<1x128xf32>
    %42 = arith.addf %40, %41 : vector<1x128xf32>
    %c0_46 = arith.constant 0 : index
    %c0_47 = arith.constant 0 : index
    %c0_48 = arith.constant 0 : index
    %43 = vector.load %arg15[%c0_46, %c0_47, %c0_48] : memref<1x1x128xf32, #tpu.memory_space<vmem>>, vector<1x1x128xf32>
    %44 = vector.shape_cast %43 : vector<1x1x128xf32> to vector<1x128xf32>
    %45 = vector.shape_cast %42 : vector<1x128xf32> to vector<1x1x128xf32>
    tpu.vector_store %arg15[%c0_46, %c0_47, %c0_48], %45 {strides = array<i32>} : memref<1x1x128xf32, #tpu.memory_space<vmem>>, vector<1x1x128xf32>,
    return
  }
  func.func @transform_0(%arg0: i32, %arg1: memref<2x15xi32, #tpu.memory_space<smem>>) -> (i32, i32, i32) {
    %c0_i32 = arith.constant 0 : i32
    %c0_i32_0 = arith.constant 0 : i32
    %c0_i32_1 = arith.constant 0 : i32
    return %arg0, %c0_i32, %c0_i32_0 : i32, i32, i32
  }
  func.func @transform_1(%arg0: i32, %arg1: memref<2x15xi32, #tpu.memory_space<smem>>) -> (i32, i32) {
    %c0_i32 = arith.constant 0 : i32
    %c0_i32_0 = arith.constant 0 : i32
    %c0_i32_1 = arith.constant 0 : i32
    return %c0_i32, %c0_i32_0 : i32, i32
  }
  func.func @transform_2(%arg0: i32, %arg1: memref<2x15xi32, #tpu.memory_space<smem>>) -> (i32, i32) {
    %c0_i32 = arith.constant 0 : i32
    %c0_i32_0 = arith.constant 0 : i32
    %c0_i32_1 = arith.constant 0 : i32
    return %c0_i32, %c0_i32_0 : i32, i32
  }
  func.func @transform_3(%arg0: i32, %arg1: memref<2x15xi32, #tpu.memory_space<smem>>) -> (i32, i32) {
    %c0_i32 = arith.constant 0 : i32
    %c0_i32_0 = arith.constant 0 : i32
    %c0_i32_1 = arith.constant 0 : i32
    return %c0_i32, %c0_i32_0 : i32, i32
  }
  func.func @transform_4(%arg0: i32, %arg1: memref<2x15xi32, #tpu.memory_space<smem>>) -> (i32, i32) {
    %c0_i32 = arith.constant 0 : i32
    %c0_i32_0 = arith.constant 0 : i32
    %c0_i32_1 = arith.constant 0 : i32
    return %c0_i32, %c0_i32_0 : i32, i32
  }
  func.func @transform_5(%arg0: i32, %arg1: memref<2x15xi32, #tpu.memory_space<smem>>) -> (i32, i32) {
    %c0_i32 = arith.constant 0 : i32
    %c0_i32_0 = arith.constant 0 : i32
    %c0_i32_1 = arith.constant 0 : i32
    return %c0_i32, %c0_i32_0 : i32, i32
  }
  func.func @transform_6(%arg0: i32, %arg1: memref<2x15xi32, #tpu.memory_space<smem>>) -> (i32, i32) {
    %c0_i32 = arith.constant 0 : i32
    %c0_i32_0 = arith.constant 0 : i32
    %c0_i32_1 = arith.constant 0 : i32
    return %c0_i32, %c0_i32_0 : i32, i32
  }
  func.func @transform_7(%arg0: i32, %arg1: memref<2x15xi32, #tpu.memory_space<smem>>) -> (i32, i32) {
    %c0_i32 = arith.constant 0 : i32
    %c0_i32_0 = arith.constant 0 : i32
    %c0_i32_1 = arith.constant 0 : i32
    return %c0_i32, %c0_i32_0 : i32, i32
  }
  func.func @transform_8(%arg0: i32, %arg1: memref<2x15xi32, #tpu.memory_space<smem>>) -> (i32, i32) {
    %c0_i32 = arith.constant 0 : i32
    %c0_i32_0 = arith.constant 0 : i32
    %c0_i32_1 = arith.constant 0 : i32
    return %c0_i32, %c0_i32_0 : i32, i32
  }
  func.func @transform_9(%arg0: i32, %arg1: memref<2x15xi32, #tpu.memory_space<smem>>) -> (i32, i32) {
    %c0_i32 = arith.constant 0 : i32
    %c0_i32_0 = arith.constant 0 : i32
    %c0_i32_1 = arith.constant 0 : i32
    return %c0_i32, %c0_i32_0 : i32, i32
  }
  func.func @transform_10(%arg0: i32, %arg1: memref<2x15xi32, #tpu.memory_space<smem>>) -> (i32, i32) {
    %c0_i32 = arith.constant 0 : i32
    %c0_i32_0 = arith.constant 0 : i32
    %c0_i32_1 = arith.constant 0 : i32
    return %c0_i32, %c0_i32_0 : i32, i32
  }
  func.func @transform_11(%arg0: i32, %arg1: memref<2x15xi32, #tpu.memory_space<smem>>) -> (i32, i32) {
    %c0_i32 = arith.constant 0 : i32
    %c0_i32_0 = arith.constant 0 : i32
    %c0_i32_1 = arith.constant 0 : i32
    return %c0_i32, %c0_i32_0 : i32, i32
  }
  func.func @transform_12(%arg0: i32, %arg1: memref<2x15xi32, #tpu.memory_space<smem>>) -> (i32, i32) {
    %c0_i32 = arith.constant 0 : i32
    %c0_i32_0 = arith.constant 0 : i32
    %c0_i32_1 = arith.constant 0 : i32
    return %c0_i32, %c0_i32_0 : i32, i32
  }
  func.func @transform_13(%arg0: i32, %arg1: memref<2x15xi32, #tpu.memory_space<smem>>) -> (i32, i32, i32) {
    %c0_i32 = arith.constant 0 : i32
    %c0_i32_0 = arith.constant 0 : i32
    %c0_i32_1 = arith.constant 0 : i32
    return %arg0, %c0_i32, %c0_i32_0 : i32, i32, i32
  }
}

</mosaic_0001>

<bundles_post_ra>
// kernel: deep_spinn_forward.1
= control target key start
LH: loop header
LB: loop body
LE: loop exit
PB: predicated region body
PF: predicated region fallthrough
CT: control target
= control target key end

     0   :  { %s1898_s0 = inlined_call_operand.vmem [shape: s32[2,15], index: 0, kind: input, shape index: {}]   ;;  %s1899_s1 = inlined_call_operand.vmem [shape: f32[2,8,16], index: 1, kind: input, shape index: {}]   ;;  %s1900_s2 = inlined_call_operand.vmem [shape: f32[16,32], index: 2, kind: input, shape index: {}]   ;;  %s1901_s3 = inlined_call_operand.vmem [shape: f32[1,32], index: 3, kind: input, shape index: {}]   ;;  %s1902_s4 = inlined_call_operand.vmem [shape: f32[32,32], index: 4, kind: input, shape index: {}]   ;;  %s1903_s5 = inlined_call_operand.vmem [shape: f32[1,32], index: 5, kind: input, shape index: {}]   ;;  %s1904_s6 = inlined_call_operand.vmem [shape: f32[32,128], index: 6, kind: input, shape index: {}]   ;;  %s1905_s7 = inlined_call_operand.vmem [shape: f32[1,128], index: 7, kind: input, shape index: {}]   ;;  %s1906_s8 = inlined_call_operand.vmem [shape: f32[48,128], index: 8, kind: input, shape index: {}]   ;;  %s1907_s9 = inlined_call_operand.vmem [shape: f32[1,128], index: 9, kind: input, shape index: {}]   ;;  %s1908_s10 = inlined_call_operand.vmem [shape: f32[32,32], index: 10, kind: input, shape index: {}]   ;;  %s1909_s11 = inlined_call_operand.vmem [shape: f32[1,32], index: 11, kind: input, shape index: {}]   ;;  %s1910_s12 = inlined_call_operand.vmem [shape: f32[32,128], index: 12, kind: input, shape index: {}]   ;;  %s1911_s13 = inlined_call_operand.vmem [shape: f32[1,128], index: 13, kind: input, shape index: {}]   ;;  %s1912_s14 = inlined_call_operand.hbm [shape: f32[2,1,128], index: 14, kind: output, shape index: {}]  }
   0x1   :  { %1913 = sst [smem:[#allocation12_spill]] %s1899_s1  ;;  %s19_s15 = sshll.u32 %s1898_s0, 4  ;;  %s20_s15 = int_to_ptr.vmem [resolvable:$true] %s19_s15 }
   0x2   :  { %1914 = sst [smem:[#allocation13_spill]] %s1900_s2  ;;  %s1431_s16 = scalar_lea.vmem %s20_s15, 32 }
   0x3   :  { %1915 = sst [smem:[#allocation14_spill]] %s1901_s3  ;;  %p1432_p0 = scmp.ne.s32.totalorder %s20_s15, %s1431_s16 }
   0x4   :  { %1916 = sst [smem:[#allocation15_spill]] %s1902_s4  ;;  %p1436_p1 = scmp.lt.s32.totalorder %s20_s15, %s20_s15 }
   0x5   :  { %1917 = sst [smem:[#allocation16_spill]] %s1903_s5  ;;  %p1437_p2 = scmp.lt.s32.totalorder %s1431_s16, %s1431_s16 }
   0x7   :  { %p1438_p3 = por %p1437_p2, %p1436_p1 }
   0x9   :  { %p1439_p4 = pnand %p1438_p3, %p1432_p0 }
   0xb   :  { %1442 = shalt.err (!%p1439_p4)  }
   0xc   :  { %s1515_s17 = smov [#allocation7]  }
   0xd   :  { %22 = dma.vmem_to_smem %s20_s15, 32, %s1515_s17, [#allocation6] }
   0xe   :  { %1489 = dma.done.wait [#allocation6], 32 }
   0xf   :  { %1490 = vsyncadd [#allocation6], 4294967264 }
  0x10   :  { %24 = sfence }
  0x11   :  { %25 = vsyncpa [#allocation9], 0 }
  0x12   :  { %27 = vsyncpa [#allocation9 + $0x1], 0  ;;  %s1612_s18 = smov 0   ;;  %s1614_s19 = smov 0  }
  0x13   :  { %s1616_s0 = smov 0   ;;  %s1618_s20 = smov 0  }
  0x14 LB: > { %s1633_s21 = sadd.s32 4294967295, %s1509_s20   ;;  %s1216_s22 = sadd.s32 4294967294, %s1509_s20   ;;  %s1509_s20 = sphi %s1618_s20, %s1930_s20   ;;  %s1505_s0 = sphi %s1616_s0, %s1929_s0   ;;  %s1501_s19 = sphi %s1614_s19, %s1928_s19   ;;  %s1497_s18 = sphi %s1612_s18, %s1927_s18  }
  0x15   : > { %s1637_s23 = sadd.s32 1, %s1509_s20   ;;  %s318_s24 = sadd.s32 1, %s1505_s0 }
  0x16   : > { %s315_s25 = ssub.s32 %s1509_s20, %s1637_s23  ;;  %p328_p5 = scmp.ne.s32.totalorder %s1505_s0, %s1501_s19 }
  0x17   : > { %p316_p6 = scmp.eq.s32.totalorder %s315_s25, 0  ;;  %p329_p7 = scmp.eq.s32.totalorder %s1633_s21, 1 }
  0x18   : > { %p334_p8 = scmp.ne.s32.totalorder %s1501_s19, %s1497_s18  ;;  %p335_p9 = scmp.eq.s32.totalorder %s1216_s22, 1 }
  0x19   : > { %s1648_s26 = scalar_select %p316_p6, %s1505_s0, %s318_s24  }
  0x1a   : > { %p1650_p10 = por %p329_p7, %p328_p5  ;;  %p1654_p11 = por %p335_p9, %p334_p8 }
  0x1b   : > { %p1219_p12 = scmp.ge.s32.totalorder %s1509_s20, 1  ;;  %p396_p13 = scmp.lt.s32.totalorder %s1509_s20, 3 }
  0x1d   : > { %p397_p0 = pnand %p1219_p12, %p396_p13 }
  0x1e   : > { %s1920_s2 = sld [smem:[#allocation13_spill]] (!%p397_p0)  ;;  %s1516_s16 = smov (!%p397_p0), 0  }
  0x1f   : > { %400 = sbr.rel (%p397_p0) target bundleno = 2533 (0x9e5), region = 72  ;;  %446 = sst [smem:[#allocation4]] (!%p397_p0), %s1516_s16 }
  0x20   : > { %s1921_s4 = sld [smem:[#allocation15_spill]] (!%p397_p0)  ;;  %p438_p1 = scmp.lt.s32.totalorder (!%p397_p0), %s1633_s21, 1 }
  0x21   : > { %448 = sst [smem:[#allocation5]] (!%p397_p0), %s1516_s16 }
  0x22   : > { %450 = sst [smem:[#allocation4 + $0x1]] (!%p397_p0), %s1516_s16 }
  0x23   : > { %452 = sst [smem:[#allocation5 + $0x1]] (!%p397_p0), %s1516_s16  ;;  %s1712_s16 = smov (!%p397_p0), 0  }
  0x24   : > { %v455_v0 = vld [vmem:[%s1920_s2 + $0x8] sm:$0xff]  ;;  %v1517_v1 = vmov 0.0   ;;  %v454_v2 = vld [vmem:[%s1920_s2] sm:$0xff]  ;;  %vm1518_vm0 = vmmov 0   ;;  %vm442_vm1 = vcmask 261120   ;;  %s439_s30 = scalar_select %p438_p1, %s1633_s21, 1 }
  0x25   : > { %1284 = vmatprep.subr.mxu0 %v1517_v1  ;;  %1288 = vmatprep.mubr.msk.f32.mxu0 %vm1518_vm0, %v1517_v1  ;;  %443 = vst.msk [vmem:[#allocation3] sm:$0xff] %vm442_vm1, %v1517_v1  ;;  %444 = vst.msk [vmem:[#allocation3 + $0x8] sm:$0xff] %vm442_vm1, %v1517_v1  ;;  %vm463_vm2 = vcmask 130048   ;;  %s1922_s1 = sld [smem:[#allocation12_spill]] }
  0x26   : > { %v542_v3 = vld [vmem:[%s1921_s4 + $0x18] sm:$0xff]  ;;  %1285 = vmatpush3.msra.mxu0 %v455_v0  ;;  %1291 = vmatprep.subr.mxu1 %v1517_v1  ;;  %s1220_s15 = sshll.u32 %s439_s30, 3  ;;  %v541_v5 = vld [vmem:[%s1921_s4 + $0x10] sm:$0xff]  ;;  %v540_v6 = vld [vmem:[%s1921_s4 + $0x8] sm:$0xff]  ;;  %s1923_s3 = sld [smem:[#allocation14_spill]] }
  0x27   : > { %1286 = vmatprep.subr.mxu0 %v1517_v1  ;;  %1292 = vmatpush3.msra.mxu1 %v542_v3  ;;  %v539_v7 = vld [vmem:[%s1921_s4] sm:$0xff]  ;;  %s1924_s5 = sld [smem:[#allocation16_spill]] }
  0x28   : > { %1287 = vmatpush3.msra.mxu0 %v454_v2  ;;  %1293 = vmatprep.subr.mxu1 %v1517_v1 }
  0x29   : > { %1299 = vmatprep.mubr.msk.f32.mxu1 %vm1518_vm0, %v1517_v1  ;;  %1294 = vmatpush3.msra.mxu1 %v541_v5 }
  0x2a   : > { %1295 = vmatprep.subr.mxu1 %v1517_v1 }
  0x2b   : > { %s441_s24 = scalar_lea.vmem %s1922_s1, %s1220_s15  ;;  %1296 = vmatpush3.msra.mxu1 %v540_v6 }
  0x2c   : > { %v453_v4 = vld [vmem:[%s441_s24] sm:$0xff]  ;;  %1297 = vmatprep.subr.mxu1 %v1517_v1  ;;  %s1925_s24 = sand.u32 1, %s1501_s19  }
  0x2d   : > { %1289 = vmatmul.mubr.msk.f32.vlgmr.msra.gmra.mxu0 %vm463_vm2, %v453_v4  ;;  %1298 = vmatpush3.msra.mxu1 %v539_v7  ;;  %v1221_v8 = vld [vmem:[%s1923_s3] ss:$0 sm:$0xff]  ;;  %s1710_s25 = scalar_lea.vmem [#allocation8], %s1925_s24 }
  0x2e   : > { %v1223_v13 = vld [vmem:[%s1924_s5] ss:$0 sm:$0xff] }
  0xed   : > { %v533_v9 = vpop.f32.mrf.mxu0 }
  0xee   : > { %v534_v10 = vadd.f32 %v1221_v8, %v533_v9 }
  0xef   : > { %v1290_v11 = vpop.f32.mrf.mxu0 }
  0xf0   : > { %537 = vst.msk [vmem:[#allocation2] sm:$0xff] %vm442_vm1, %v534_v10  ;;  %v538_v12 = vmax.f32 %v534_v10, 0.0 }
  0xf2   : > { %1300 = vmatmul.mubr.msk.f32.vlgmr.msra.gmra.mxu1 %vm442_vm1, %v538_v12 }
 0x1b2   : > { %v619_v14 = vpop.f32.mrf.mxu1 }
 0x1b3   : > { %v620_v15 = vadd.f32 %v1223_v13, %v619_v14 }
 0x1b4   : > { %v1301_v16 = vpop.f32.mrf.mxu1 }
 0x1b5   : > { %624 = vst.msk [vmem:[#allocation2 + $0x8] sm:$0xff] %vm442_vm1, %v620_v15 }
 0x1b6 LB: >> { %s1717_s30 = sld [smem:[#allocation4]]  ;;  %s631_s17 = sshra.s32 %s1513_s16, 7  ;;  %s1513_s16 = sphi %s1712_s16, %s630_s16  }
 0x1b7   : >> { %s641_s15 = sld [smem:[#allocation5]]  ;;  %s636_s22 = sand.u32 127, %s1513_s16 }
 0x1b8   : >> { %s633_s2 = sadd.s32 %s1633_s21, %s631_s17 }
 0x1b9   : >> { %s1225_s29 = sshll.u32 %s633_s2, 7 }
 0x1ba   : >> { %s637_s1 = sadd.s32 %s1225_s29, %s636_s22 }
 0x1bb   : >> { %s1722_s24 = sld [smem:[#allocation7 + %s637_s1]] }
 0x1c1   : >> { %p1226_p2 = scmp.ne.s32.totalorder %s1722_s24, 0 }
 0x1c2   : >> { %p645_p3 = scmp.lt.s32.totalorder (!%p1226_p2), %s641_s15, 7  ;;  %p649_p4 = scmp.lt.s32.totalorder (!%p1226_p2), %s1717_s30, 7 }
 0x1c3   : >> { %644 = sbr.rel (%p1226_p2) target bundleno = 461 (0x1cd), region = 83  ;;  %s654_s3 = sadd.s32 (!%p1226_p2), 1, %s1717_s30 }
 0x1c4   : >> { %s656_s4 = sadd.s32 (!%p1226_p2), 1, %s641_s15  ;;  %655 = sst [smem:[#allocation4]] (!%p1226_p2), %s654_s3 }
 0x1c5   : >> { %657 = sst [smem:[#allocation5]] (!%p1226_p2), %s656_s4 }
 0x1c8   : >> { %s1932_s15 = smov (!%p645_p3, %s641_s15), 7  ;;  %vm652_vm3 = vcmask 253952  }
 0x1c9   : >> { %s650_s5 = scalar_select %p649_p4, %s1717_s30, 7 }
 0x1ca   : >> { %s647_s17 = scalar_lea.vmem [#allocation2], %s1932_s15 }
 0x1cb   : >> { %v648_v17 = vld [vmem:[%s647_s17] sm:$0x1]  ;;  %s651_s1 = scalar_lea.vmem [#allocation3], %s650_s5 }
 0x1cc   : >> { %653 = vst.msk [vmem:[%s651_s1] sm:$0x1] %vm652_vm3, %v648_v17 }
 0x1cd PF: >> { %p1227_p5 = scmp.eq.s32.totalorder %s1722_s24, 0 }
 0x1ce   : >> { %s1228_s22 = sadd.s32 (!%p1227_p5), 4294967295, %s1717_s30  ;;  %s1521_s29 = smov (!%p1227_p5), 16  }
 0x1cf   : >> { %661 = sbr.rel (%p1227_p5) target bundleno = 1278 (0x4fe), region = 87  ;;  %p663_p6 = scmp.gt.s32.totalorder (!%p1227_p5), %s1228_s22, 0 }
 0x1d0   : >> { %792 = sst [smem:[#allocation4]] (!%p1227_p5), %s1228_s22  ;;  %s1229_s3 = sadd.s32 (!%p1227_p5), 4294967294, %s1717_s30 }
 0x1d1   : >> { %p668_p7 = scmp.gt.s32.totalorder (!%p1227_p5), %s1229_s3, 0  ;;  %s1522_s30 = smov (!%p1227_p5), 64  }
 0x1d2   : >> { %s1523_s15 = smov (!%p1227_p5), 112   ;;  %s1524_s17 = smov (!%p1227_p5), 32  }
 0x1d3   : >> { %s1525_s1 = smov (!%p1227_p5), 80  }
 0x1d4   : >> { %v680_v18 = vld [vmem:[%s1904_s6 + $0x18] sm:$0xff]  ;;  %v1519_v19 = vmov 0.0   ;;  %v679_v20 = vld [vmem:[%s1904_s6 + $0x10] sm:$0xff]  ;;  %vm1520_vm4 = vmmov 0   ;;  %s1934_s22 = smov (!%p663_p6, %s1228_s22), 0  ;;  %v678_v21 = vld [vmem:[%s1904_s6 + $0x8] sm:$0xff] }
 0x1d5   : >> { %1302 = vmatprep.subr.mxu0 %v1519_v19  ;;  %1310 = vmatprep.mubr.msk.f32.mxu0 %vm1520_vm4, %v1519_v19  ;;  %v677_v22 = vld [vmem:[%s1904_s6] sm:$0xff]  ;;  %s665_s2 = scalar_lea.vmem [#allocation3], %s1934_s22  ;;  %s1936_s3 = smov (!%p668_p7, %s1229_s3), 0  ;;  %vm790_vm5 = vcmask 253952  }
 0x1d6   : >> { %1303 = vmatpush3.msra.mxu0 %v680_v18  ;;  %v666_v23 = vld [vmem:[%s665_s2] sm:$0x1]  ;;  %s670_s4 = scalar_lea.vmem [#allocation3], %s1936_s3 }
 0x1d7   : >> { %1304 = vmatprep.subr.mxu0 %v1519_v19  ;;  %673 = vrot.lane.b32.xlu0 %v666_v23, %s1521_s29  ;;  %v671_v24 = vld [vmem:[%s670_s4] sm:$0x1] }
 0x1d8   : >> { %1305 = vmatpush3.msra.mxu0 %v679_v20  ;;  %v681_v27 = vld [vmem:[%s1905_s7] sm:$0x1] }
 0x1d9   : >> { %1306 = vmatprep.subr.mxu0 %v1519_v19 }
 0x1da   : >> { %1307 = vmatpush3.msra.mxu0 %v678_v21 }
 0x1db   : >> { %1308 = vmatprep.subr.mxu0 %v1519_v19 }
 0x1dc   : >> { %1309 = vmatpush3.msra.mxu0 %v677_v22 }
 0x249   : >> { %v674_v25 = vpop.permute.xlu0 %673 }
 0x24a   : >> { %v676_v26 = vsel %vm463_vm2, %v671_v24, %v674_v25 }
 0x24b   : >> { %1311 = vmatmul.mubr.msk.f32.vlgmr.msra.gmra.mxu0 %vm442_vm1, %v676_v26 }
 0x30b   : >> { %v751_v28 = vpop.f32.mrf.mxu0 }
 0x30c   : >> { %v752_v29 = vadd.f32 %v751_v28, %v681_v27 }
 0x30d   : >> { %v1312_v30 = vpop.f32.mrf.mxu0 }
 0x30e   : >> { %v1231_v31 = vmul.f32 -1.442695, %v752_v29  ;;  %1415 = vtanh.f32 %v752_v29 }
 0x310   : >> { %1417 = vpow2.f32 %v1231_v31 }
 0x31b   : >> { %v1416_v32 = vpop.eup %1415 }
 0x31c   : >> { %770 = vrot.lane.b32.xlu0 %v1416_v32, %s1522_s30 }
 0x31d   : >> { %v1418_v33 = vpop.eup %1417 }
 0x31e   : >> { %v758_v34 = vadd.f32 1.0, %v1418_v33 }
 0x320   : >> { %1419 = vrcp.f32 %v758_v34 }
 0x32d   : >> { %v1420_v35 = vpop.eup %1419 }
 0x32e   : >> { %v762_v36 = vmul.f32 %v1420_v35, %v674_v25  ;;  %v761_v40 = vmul.f32 %v1420_v35, %v671_v24 }
 0x330   : >> { %764 = vrot.lane.b32.xlu1 %v762_v36, %s1523_s15 }
 0x38e   : >> { %v771_v37 = vpop.permute.xlu0 %770 }
 0x38f   : >> { %v773_v38 = vmul.f32 %v1420_v35, %v771_v37 }
 0x391   : >> { %775 = vrot.lane.b32.xlu1 %v773_v38, %s1521_s29 }
 0x3a2   : >> { %v765_v39 = vpop.permute.xlu1 %764 }
 0x3a3   : >> { %v767_v41 = vadd.f32 %v765_v39, %v761_v40 }
 0x403   : >> { %v776_v42 = vpop.permute.xlu1 %775 }
 0x404   : >> { %v778_v43 = vadd.f32 %v776_v42, %v767_v41 }
 0x406   : >> { %1421 = vtanh.f32 %v778_v43 }
 0x413   : >> { %v1422_v44 = vpop.eup %1421 }
 0x414   : >> { %781 = vrot.lane.b32.xlu0 %v1422_v44, %s1524_s17 }
 0x486   : >> { %v782_v45 = vpop.permute.xlu0 %781 }
 0x487   : >> { %v784_v46 = vmul.f32 %v1420_v35, %v782_v45 }
 0x489   : >> { %786 = vrot.lane.b32.xlu1 %v784_v46, %s1525_s1 }
 0x4fb   : >> { %v787_v47 = vpop.permute.xlu1 %786 }
 0x4fc   : >> { %v789_v48 = vsel %vm463_vm2, %v787_v47, %v778_v43 }
 0x4fd   : >> { %791 = vst.msk [vmem:[%s670_s4] sm:$0x1] %vm790_vm5, %v789_v48 }
 0x4fe PF: >> { %s793_s2 = sld [smem:[#allocation4]] }
 0x4ff   : >> { %s1762_s29 = sld [smem:[#allocation4 + $0x1]] }
 0x500   : >> { %s1234_s22 = sld [smem:[#allocation5 + $0x1]] }
 0x504   : >> { %s1232_s5 = sadd.s32 4294967295, %s793_s2 }
 0x505   : >> { %p795_p8 = scmp.gt.s32.totalorder %s1232_s5, 0  ;;  %803 = sbr.rel (%p1226_p2) target bundleno = 1295 (0x50f), region = 91 }
 0x506   : >> { %p804_p9 = scmp.lt.s32.totalorder (!%p1226_p2), %s1234_s22, 7  ;;  %p809_p12 = scmp.lt.s32.totalorder (!%p1226_p2), %s1762_s29, 7 }
 0x507   : >> { %s1938_s5 = smov (!%p795_p8, %s1232_s5), 0  ;;  %s815_s3 = sadd.s32 (!%p1226_p2), 1, %s1762_s29 }
 0x508   : >> { %s797_s30 = scalar_lea.vmem [#allocation3], %s1938_s5  ;;  %s817_s4 = sadd.s32 (!%p1226_p2), 1, %s1234_s22 }
 0x509   : >> { %v798_v49 = vld [vmem:[%s797_s30] sm:$0x1]  ;;  %816 = sst [smem:[#allocation4 + $0x1]] (!%p1226_p2), %s815_s3 }
 0x50a   : >> { %s1940_s22 = smov (!%p804_p9, %s1234_s22), 7  ;;  %vm813_vm6 = vcmask 253952   ;;  %818 = sst [smem:[#allocation5 + $0x1]] %s817_s4 }
 0x50b   : >> { %s810_s15 = scalar_select %p809_p12, %s1762_s29, 7 }
 0x50c   : >> { %s1174_s17 = scalar_lea.vmem [#allocation2], %s1940_s22 }
 0x50d   : >> { %v1236_v50 = vld [vmem:[%s1174_s17 + $0x8] sm:$0x1]  ;;  %s1176_s1 = scalar_lea.vmem [#allocation3], %s810_s15 }
 0x50e   : >> { %1237 = vst.msk [vmem:[%s1176_s1 + $0x8] sm:$0x1] %vm813_vm6, %v1236_v50 }
 0x50f PF: >> { %821 = sbr.rel (%p1227_p5) target bundleno = 2114 (0x842), region = 95  ;;  %s1239_s2 = sadd.s32 (!%p1227_p5), 4294967295, %s1762_s29 }
 0x510   : >> { %p823_p13 = scmp.gt.s32.totalorder (!%p1227_p5), %s1239_s2, 0  ;;  %962 = sst [smem:[#allocation4 + $0x1]] (!%p1227_p5), %s1239_s2 }
 0x511   : >> { %s1528_s5 = smov (!%p1227_p5), 16   ;;  %s1529_s4 = smov (!%p1227_p5), 32  }
 0x512   : >> { %s1531_s30 = smov (!%p1227_p5), 112   ;;  %s1532_s3 = smov (!%p1227_p5), 80  }
 0x514   : >> { %v849_v51 = vld [vmem:[%s1906_s8 + $0x28] sm:$0xff]  ;;  %v1526_v52 = vmov 0.0   ;;  %v848_v53 = vld [vmem:[%s1906_s8 + $0x20] sm:$0xff]  ;;  %vm1527_vm7 = vmmov 0   ;;  %s1942_s2 = smov (!%p823_p13, %s1239_s2), 0  ;;  %v847_v54 = vld [vmem:[%s1906_s8 + $0x18] sm:$0xff] }
 0x515   : >> { %1313 = vmatprep.subr.mxu0 %v1526_v52  ;;  %1325 = vmatprep.mubr.msk.f32.mxu0 %vm1527_vm7, %v1526_v52  ;;  %v846_v55 = vld [vmem:[%s1906_s8 + $0x10] sm:$0xff]  ;;  %s1178_s1 = scalar_lea.vmem [#allocation3], %s1942_s2  ;;  %v845_v57 = vld [vmem:[%s1906_s8 + $0x8] sm:$0xff]  ;;  %v844_v58 = vld [vmem:[%s1906_s8] sm:$0xff]  ;;  %s1241_s2 = sadd.s32 4294967294, %s1762_s29  ;;  %vm851_vm8 = vcmask 392192  }
 0x516   : >> { %1314 = vmatpush3.msra.mxu0 %v849_v51  ;;  %v1240_v56 = vld [vmem:[%s1178_s1 + $0x8] sm:$0x1]  ;;  %p829_p0 = scmp.gt.s32.totalorder %s1241_s2, 0  ;;  %v850_v0 = vld [vmem:[%s1907_s9] sm:$0x1]  ;;  %s1530_s29 = smov 64  }
 0x517   : >> { %1315 = vmatprep.subr.mxu0 %v1526_v52  ;;  %835 = vrot.lane.b32.xlu0 %v1240_v56, %s1528_s5  ;;  %vm960_vm9 = vcmask 253952  }
 0x518   : >> { %1316 = vmatpush3.msra.mxu0 %v848_v53  ;;  %s1944_s2 = smov (!%p829_p0, %s1241_s2), 0 }
 0x519   : >> { %1317 = vmatprep.subr.mxu0 %v1526_v52  ;;  %s1180_s15 = scalar_lea.vmem [#allocation3], %s1944_s2 }
 0x51a   : >> { %1318 = vmatpush3.msra.mxu0 %v847_v54  ;;  %v1242_v60 = vld [vmem:[%s1180_s15 + $0x8] sm:$0x1] }
 0x51b   : >> { %1319 = vmatprep.subr.mxu0 %v1526_v52  ;;  %839 = vrot.lane.b32.xlu0 %v798_v49, %s1529_s4 }
 0x51c   : >> { %1320 = vmatpush3.msra.mxu0 %v846_v55 }
 0x51d   : >> { %1321 = vmatprep.subr.mxu0 %v1526_v52 }
 0x51e   : >> { %1322 = vmatpush3.msra.mxu0 %v845_v57 }
 0x51f   : >> { %1323 = vmatprep.subr.mxu0 %v1526_v52 }
 0x520   : >> { %1324 = vmatpush3.msra.mxu0 %v844_v58 }
 0x589   : >> { %v836_v59 = vpop.permute.xlu0 %835 }
 0x58a   : >> { %v842_v61 = vsel %vm463_vm2, %v1242_v60, %v836_v59 }
 0x58d   : >> { %v840_v62 = vpop.permute.xlu0 %839 }
 0x58e   : >> { %v843_v63 = vsel %vm442_vm1, %v842_v61, %v840_v62 }
 0x58f   : >> { %1326 = vmatmul.mubr.msk.f32.vlgmr.msra.gmra.mxu0 %vm851_vm8, %v843_v63 }
 0x64f   : >> { %v921_v2 = vpop.f32.mrf.mxu0 }
 0x650   : >> { %v922_v3 = vadd.f32 %v921_v2, %v850_v0 }
 0x651   : >> { %v1327_v4 = vpop.f32.mrf.mxu0 }
 0x652   : >> { %v1244_v5 = vmul.f32 -1.442695, %v922_v3  ;;  %1423 = vtanh.f32 %v922_v3 }
 0x654   : >> { %1425 = vpow2.f32 %v1244_v5 }
 0x65f   : >> { %v1424_v6 = vpop.eup %1423 }
 0x660   : >> { %940 = vrot.lane.b32.xlu1 %v1424_v6, %s1530_s29 }
 0x661   : >> { %v1426_v7 = vpop.eup %1425 }
 0x662   : >> { %v928_v8 = vadd.f32 1.0, %v1426_v7 }
 0x664   : >> { %1427 = vrcp.f32 %v928_v8 }
 0x671   : >> { %v1428_v9 = vpop.eup %1427 }
 0x672   : >> { %v932_v10 = vmul.f32 %v1428_v9, %v836_v59  ;;  %v931_v14 = vmul.f32 %v1428_v9, %v1242_v60 }
 0x674   : >> { %934 = vrot.lane.b32.xlu1 %v932_v10, %s1531_s30 }
 0x6d2   : >> { %v941_v11 = vpop.permute.xlu1 %940 }
 0x6d3   : >> { %v943_v12 = vmul.f32 %v1428_v9, %v941_v11 }
 0x6d5   : >> { %945 = vrot.lane.b32.xlu0 %v943_v12, %s1528_s5 }
 0x6e6   : >> { %v935_v13 = vpop.permute.xlu1 %934 }
 0x6e7   : >> { %v937_v15 = vadd.f32 %v935_v13, %v931_v14 }
 0x747   : >> { %v946_v16 = vpop.permute.xlu0 %945 }
 0x748   : >> { %v948_v17 = vadd.f32 %v946_v16, %v937_v15 }
 0x74a   : >> { %1429 = vtanh.f32 %v948_v17 }
 0x757   : >> { %v1430_v18 = vpop.eup %1429 }
 0x758   : >> { %951 = vrot.lane.b32.xlu1 %v1430_v18, %s1529_s4 }
 0x7ca   : >> { %v952_v19 = vpop.permute.xlu1 %951 }
 0x7cb   : >> { %v954_v20 = vmul.f32 %v1428_v9, %v952_v19 }
 0x7cd   : >> { %956 = vrot.lane.b32.xlu0 %v954_v20, %s1532_s3 }
 0x83f   : >> { %v957_v21 = vpop.permute.xlu0 %956 }
 0x840   : >> { %v959_v22 = vsel %vm463_vm2, %v957_v21, %v948_v17 }
 0x841   : >> { %1245 = vst.msk [vmem:[%s1180_s15 + $0x8] sm:$0x1] %vm960_vm9, %v959_v22 }
 0x842 PF: >> { %s630_s16 = sadd.s32 1, %s1513_s16  }
 0x843   : >> { %p627_p1 = scmp.ge.s32.totalorder %s630_s16, 15  }
 0x844   : > { %1328 = vmatprep.subr.mxu0 (%p627_p1), %v1517_v1  ;;  %v973_v23 = vld [vmem:[%s1908_s10 + $0x18] sm:$0xff] (%p627_p1)  ;;  %v972_v24 = vld [vmem:[%s1908_s10 + $0x10] sm:$0xff] (%p627_p1)  ;;  %1336 = vmatprep.mubr.msk.f32.mxu0 (%p627_p1), %vm1518_vm0, %v1517_v1  ;;  %s1246_s2 = sld [smem:[#allocation4 + $0x1]] (%p627_p1)  ;;  %v971_v26 = vld [vmem:[%s1908_s10 + $0x8] sm:$0xff] (%p627_p1)  ;;  %s1926_s15 = sand.u32 (%p627_p1), 1, %s1501_s19  }
 0x845   : > { %629 = sbr.rel (!%p627_p1) target bundleno = 438 (0x1b6), region = 145  ;;  %1329 = vmatpush3.msra.mxu0 (%p627_p1), %v973_v23  ;;  %1339 = vmatprep.subr.mxu1 (%p627_p1), %v1517_v1  ;;  %v1052_v25 = vld [vmem:[%s1910_s12 + $0x18] sm:$0xff] (%p627_p1)  ;;  %v970_v27 = vld [vmem:[%s1908_s10] sm:$0xff] (%p627_p1)  ;;  %v1051_v29 = vld [vmem:[%s1910_s12 + $0x10] sm:$0xff] (%p627_p1)  ;;  %s1533_s17 = smov (%p627_p1), [#allocation8]  }
 0x846   : > { %1330 = vmatprep.subr.mxu0 (%p627_p1), %v1517_v1  ;;  %1340 = vmatpush3.msra.mxu1 (%p627_p1), %v1052_v25  ;;  %v1050_v30 = vld [vmem:[%s1910_s12 + $0x8] sm:$0xff] (%p627_p1)  ;;  %v1049_v31 = vld [vmem:[%s1910_s12] sm:$0xff] (%p627_p1) }
 0x847   : > { %1331 = vmatpush3.msra.mxu0 (%p627_p1), %v972_v24  ;;  %1341 = vmatprep.subr.mxu1 (%p627_p1), %v1517_v1  ;;  %v974_v32 = vld [vmem:[%s1909_s11] sm:$0x1] (%p627_p1) }
 0x848   : > { %1332 = vmatprep.subr.mxu0 (%p627_p1), %v1517_v1  ;;  %1347 = vmatprep.mubr.msk.f32.mxu1 (%p627_p1), %vm1518_vm0, %v1517_v1 }
 0x849   : > { %1333 = vmatpush3.msra.mxu0 (%p627_p1), %v971_v26  ;;  %1342 = vmatpush3.msra.mxu1 (%p627_p1), %v1051_v29 }
 0x84a   : > { %1334 = vmatprep.subr.mxu0 %v1517_v1  ;;  %s1247_s3 = sadd.s32 4294967295, %s1246_s2  ;;  %1343 = vmatprep.subr.mxu1 %v1517_v1  ;;  %s1129_s2 = scalar_lea.sflag [#allocation9], %s1926_s15 }
 0x84b   : > { %1335 = vmatpush3.msra.mxu0 %v970_v27  ;;  %p965_p2 = scmp.gt.s32.totalorder %s1247_s3, 0  ;;  %1344 = vmatpush3.msra.mxu1 %v1050_v30 }
 0x84c   : > { %1345 = vmatprep.subr.mxu1 %v1517_v1  ;;  %v1053_v1 = vld [vmem:[%s1911_s13] sm:$0x1] }
 0x84d   : > { %s1946_s3 = smov (!%p965_p2, %s1247_s3), 0  ;;  %1346 = vmatpush3.msra.mxu1 %v1049_v31 }
 0x84e   : > { %s1182_s5 = scalar_lea.vmem [#allocation3], %s1946_s3  ;;  %s1251_s3 = sshll.u32 %s1633_s21, 4 }
 0x84f   : > { %v1248_v28 = vld [vmem:[%s1182_s5 + $0x8] sm:$0x1]  ;;  %s1141_s5 = sshll.u32 %s1710_s25, 4  ;;  %s1860_s4 = scalar_lea.hbm %s1912_s14, %s1251_s3  ;;  %s1142_s5 = int_to_ptr.vmem [resolvable:$true] %s1141_s5 }
 0x850   : > { %1337 = vmatmul.mubr.msk.f32.vlgmr.msra.gmra.mxu0 %vm442_vm1, %v1248_v28  ;;  %s1443_s16 = scalar_lea.vmem %s1142_s5, 16  ;;  %s1447_s21 = sshll.u32 %s1533_s17, 4  ;;  %s1448_s21 = int_to_ptr.vmem [resolvable:$false] %s1447_s21 }
 0x851   : > { %p1444_p3 = scmp.ne.s32.totalorder %s1142_s5, %s1443_s16  ;;  %s1449_s1 = scalar_lea.vmem %s1448_s21, 32 }
 0x852   : > { %p1450_p6 = scmp.lt.s32.totalorder %s1142_s5, %s1448_s21  ;;  %p1451_p7 = scmp.lt.s32.totalorder %s1449_s1, %s1443_s16 }
 0x853   : > { %p1445_p4 = pnand %p1444_p3, %p1650_p10 }
 0x854   : > { %p1452_p8 = por %p1451_p7, %p1450_p6 }
 0x855   : > { %p1446_p5 = pneg %p1445_p4 }
 0x857   : > { %p1453_p9 = pnand %p1452_p8, %p1446_p5 }
 0x910   : > { %v1044_v33 = vpop.f32.mrf.mxu0 }
 0x911   : > { %v1045_v34 = vadd.f32 %v1044_v33, %v974_v32 }
 0x912   : > { %v1338_v35 = vpop.f32.mrf.mxu0 }
 0x913   : > { %v1048_v36 = vmax.f32 %v1045_v34, 0.0 }
 0x915   : > { %1348 = vmatmul.mubr.msk.f32.vlgmr.msra.gmra.mxu1 %vm442_vm1, %v1048_v36 }
 0x9d5   : > { %v1123_v37 = vpop.f32.mrf.mxu1 }
 0x9d6   : > { %v1124_v38 = vadd.f32 %v1123_v37, %v1053_v1 }
 0x9d7   : > { %v1349_v39 = vpop.f32.mrf.mxu1 }
 0x9d8   : > { %1127 = vst [vmem:[%s1710_s25] sm:$0x1] %v1124_v38 }
 0x9d9   : > { %1456 = shalt.err (!%p1453_p9)
}
 0x9da   : > { %s1457_s25 = scalar_lea.hbm %s1860_s4, 16  ;;  %s1461_s3 = scalar_lea.hbm %s1912_s14, 32 }
 0x9db   : > { %p1458_p12 = scmp.ne.s32.totalorder %s1860_s4, %s1457_s25  ;;  %p1462_p1 = scmp.lt.s32.totalorder %s1860_s4, %s1912_s14 }
 0x9dc   : > { %p1463_p2 = scmp.lt.s32.totalorder %s1461_s3, %s1457_s25 }
 0x9dd   : > { %p1459_p13 = pnand %p1458_p12, %p1650_p10 }
 0x9de   : > { %p1464_p3 = por %p1463_p2, %p1462_p1 }
 0x9df   : > { %p1460_p0 = pneg %p1459_p13 }
 0x9e1   : > { %p1465_p4 = pnand %p1464_p3, %p1460_p0 }
 0x9e3   : > { %1468 = shalt.err (!%p1465_p4)
}
 0x9e4   : > { %1350 = dma.vmem_to_hbm [thread:$0]  (%p1650_p10), %s1142_s5, 16, %s1860_s4, %s1129_s2  }
 0x9e5 PF: > { %p1356_p5 = scmp.ge.s32.totalorder %s1509_s20, 2  ;;  %s1153_s15 = sand.u32 1, %s1497_s18  }
 0x9e6   : > { %s1154_s16 = scalar_lea.sflag [#allocation9], %s1153_s15 }
 0x9e7   : > { %p1353_p6 = pnand %p1356_p5, %p1654_p11 }
 0x9e9   : > { %p1354_p7 = pneg %p1353_p6 }
 0x9eb   : > { %1492 = dma.done.wait (%p1354_p7), %s1154_s16, 16  }
 0x9ec   : > { %1494 = vsyncadd (%p1354_p7), %s1154_s16, 4294967280  ;;  %p30_p8 = scmp.ge.s32.totalorder %s1637_s23, 4   ;;  %s1927_s18 = smov %s1501_s19 }
 0x9ed   : > { %s1928_s19 = smov %s1505_s0  ;;  %s1929_s0 = smov %s1648_s26 }
 0x9ee   : > { %s1930_s20 = smov %s1637_s23  ;;  %32 = sbr.rel (!%p30_p8) target bundleno = 20 (0x14), region = 156 }
 0x9f3   :  { %1158 = vsyncpa [#allocation9], 1 }
 0x9f4   :  { %1160 = vsyncpa [#allocation9 + $0x1], 1 }

</bundles_post_ra>
